<compile_context>
chip_gen: v5e
topology: v5e:2x2
jax: 0.10.0
libtpu: 0.0.40
codegen_flags: <defaults>
</compile_context>

<pallas_src>
import functools

import jax
import jax.numpy as jnp
from jax.experimental import pallas as pl
from jax.experimental.pallas import tpu as pltpu

LANES = 128
SUBLANES = 8
MAX_BLOCK_ROWS = 2048      # (2048, 128) f32 = 1 MiB per input per pipeline buffer
MAX_PROD_CHUNK = 64        # <= 64 factors in (1, 2]: product <= 2^64 << f32 max
_MASK_Z = -1.0e30          # masked z: max(z,0)=0 and exp(-|z|)==0 -> contributes 0


def _cdiv(a: int, b: int) -> int:
    return -(-a // b)


def _round_up(x: int, m: int) -> int:
    return _cdiv(x, m) * m


def _largest_divisor_leq(x: int, cap: int) -> int:
    for d in range(min(x, cap), 0, -1):
        if x % d == 0:
            return d
    return 1


@functools.lru_cache(maxsize=None)
def _num_tc_splits() -> int:
    """Leading 'parallel' grid-axis size: >1 only where multiple TensorCores exist."""
    try:
        kind = jax.devices()[0].device_kind.lower()
    except Exception:
        return 1
    if "v7" in kind:                       # v7x: 2 TensorCores per chip
        return 2
    if "v4" in kind or "v5p" in kind:      # megacore chips: 2 TCs share the grid
        return 2
    return 1                               # v5e / v6e: single TC -> split is pure overhead


def _make_bpr_kernel(n_valid, num_tiles, block_rows, groups, chunk):
    block_elems = block_rows * LANES
    gc = groups // chunk   # number of (8,128) groups per log-flush

    def tile_nll_sum(z):
        # z: (block_rows, 128) f32 -> (8, 128) partial sum of softplus(z).
        #   softplus(z) = max(z, 0) + log(1 + exp(-|z|))
        # The log is amortized: multiply `chunk` factors (each in (1, 2]) per
        # (group, sublane, lane) and take one log per chunk -> ~1 EUP op/element.
        z4 = z.reshape(gc, chunk, SUBLANES, LANES)
        zt = z4[:, 0]
        lin = jnp.maximum(zt, 0.0)
        prod = 1.0 + jnp.exp(-jnp.abs(zt))
        for t in range(1, chunk):          # static unroll; VPU muls/adds only
            zt = z4[:, t]
            lin = lin + jnp.maximum(zt, 0.0)
            prod = prod * (1.0 + jnp.exp(-jnp.abs(zt)))
        return jnp.sum(lin + jnp.log(prod), axis=0)

    def kernel(pos_ref, neg_ref, out_ref, acc_ref):
        c = pl.program_id(0)
        i = pl.program_id(1)

        @pl.when(i == 0)
        def _init():
            acc_ref[...] = jnp.zeros_like(acc_ref)

        start = (c * num_tiles + i) * block_elems   # logical (un-clamped) offset

        # Hot path: every element of the tile is valid data.
        @pl.when(start + block_elems <= n_valid)
        def _full_tile():
            z = neg_ref[...].astype(jnp.float32) - pos_ref[...].astype(jnp.float32)
            acc_ref[...] += tile_nll_sum(z)

        # Cold path: tile straddles (or lies past) the end of the data -> mask.
        @pl.when(start + block_elems > n_valid)
        def _edge_tile():
            z = neg_ref[...].astype(jnp.float32) - pos_ref[...].astype(jnp.float32)
            row = jax.lax.broadcasted_iota(jnp.int32, (block_rows, LANES), 0)
            lane = jax.lax.broadcasted_iota(jnp.int32, (block_rows, LANES), 1)
            idx = start + row * LANES + lane
            acc_ref[...] += tile_nll_sum(jnp.where(idx < n_valid, z, _MASK_Z))

        @pl.when(i == pl.num_programs(1) - 1)
        def _flush():
            # One cross-sublane reduce per split; (1, 128) lane-dense partial.
            out_ref[0, :] = jnp.sum(acc_ref[...], axis=0)

    return kernel


@jax.jit
def bpr_loss(pos_score: jax.Array, neg_score: jax.Array) -> jax.Array:
    """Pallas TPU implementation of BPRLoss.forward (sum over all elements)."""
    assert pos_score.shape == neg_score.shape
    pos = pos_score.reshape(-1)
    neg = neg_score.reshape(-1)
    n = pos.shape[0]
    if n == 0:
        return jnp.zeros((), jnp.float32)

    rows = _cdiv(n, LANES)

    # --- grid geometry: even row distribution, no full-tile padding ----------
    num_splits = _num_tc_splits()
    if rows < num_splits * 2 * SUBLANES:       # don't split tiny inputs
        num_splits = 1
    rows_per_split = _cdiv(rows, num_splits)
    num_tiles = _cdiv(rows_per_split, MAX_BLOCK_ROWS)
    block_rows = _round_up(_cdiv(rows_per_split, num_tiles), SUBLANES)

    # The HBM view must have at least block_rows rows; only tiny single-tile
    # ragged inputs ever need the extra (<= 7) rows.
    hbm_rows = max(rows, block_rows)
    pad = hbm_rows * LANES - n
    if pad:
        # Only when N % 128 != 0 (or the tiny-input case above): a < 1 KiB tail
        # pad so the 1-D -> 2-D reshape is legal.  Padded elements are masked to
        # zero inside the kernel, so the pad value is irrelevant.
        pos = jnp.pad(pos, (0, pad))
        neg = jnp.pad(neg, (0, pad))
    pos2d = pos.reshape(hbm_rows, LANES)       # metadata-only reshape
    neg2d = neg.reshape(hbm_rows, LANES)

    last_block = _cdiv(hbm_rows, block_rows) - 1
    groups = block_rows // SUBLANES
    chunk = _largest_divisor_leq(groups, MAX_PROD_CHUNK)

    def in_index_map(c, i):
        # Clamp grid steps past the last valid block so the DMA never leaves the
        # array; their contribution is masked to exactly 0 inside the kernel.
        return (jnp.minimum(c * num_tiles + i, last_block), 0)

    kernel = _make_bpr_kernel(n, num_tiles, block_rows, groups, chunk)

    partials = pl.pallas_call(
        kernel,
        out_shape=jax.ShapeDtypeStruct((num_splits, LANES), jnp.float32),
        grid=(num_splits, num_tiles),
        in_specs=[
            pl.BlockSpec((block_rows, LANES), in_index_map),
            pl.BlockSpec((block_rows, LANES), in_index_map),
        ],
        out_specs=pl.BlockSpec((1, LANES), lambda c, i: (c, 0)),
        scratch_shapes=[pltpu.VMEM((SUBLANES, LANES), jnp.float32)],
        compiler_params=pltpu.CompilerParams(
            dimension_semantics=("parallel", "arbitrary"),
            vmem_limit_bytes=32 * 1024 * 1024,
        ),
        cost_estimate=pl.CostEstimate(
            flops=8 * n,
            transcendentals=n + (hbm_rows * LANES) // chunk,
            bytes_accessed=2 * 4 * hbm_rows * LANES + 4 * num_splits * LANES,
        ),
    )(pos2d, neg2d)

    # Tiny cross-split / cross-lane finish in XLA.
    return jnp.sum(partials)


def _reference(pos_score, neg_score):
    # Matches torch: -F.sigmoid(pos - neg).log().sum()
    return -jnp.sum(jnp.log(jax.nn.sigmoid(pos_score - neg_score)))


if __name__ == "__main__":
    key = jax.random.PRNGKey(0)
    k_pos, k_neg = jax.random.split(key)

    # Main run: small batch of (user, pos item, neg item) scores.
    N = 2048
    pos_score = jax.random.normal(k_pos, (N,), dtype=jnp.float32)
    neg_score = jax.random.normal(k_neg, (N,), dtype=jnp.float32)

    loss = bpr_loss(pos_score, neg_score)
    jax.block_until_ready(loss)
    ref = _reference(pos_score, neg_score)
    assert jnp.allclose(loss, ref, rtol=1e-5, atol=1e-3), (loss, ref)

    # Ragged size (exercises the in-kernel masking path; padded elems contribute 0).
    M = 1000
    loss_r = bpr_loss(pos_score[:M], neg_score[:M])
    jax.block_until_ready(loss_r)
    ref_r = _reference(pos_score[:M], neg_score[:M])
    assert jnp.allclose(loss_r, ref_r, rtol=1e-5, atol=1e-3), (loss_r, ref_r)

    # Larger ragged case: multi-tile grid + edge mask + amortized-log product path.
    K = 300_000
    kp2, kn2 = jax.random.split(jax.random.PRNGKey(1))
    pos_big = jax.random.normal(kp2, (K,), dtype=jnp.float32)
    neg_big = jax.random.normal(kn2, (K,), dtype=jnp.float32)
    loss_b = bpr_loss(pos_big, neg_big)
    jax.block_until_ready(loss_b)
    ref_b = _reference(pos_big, neg_big)
    assert jnp.allclose(loss_b, ref_b, rtol=1e-4, atol=1e-2), (loss_b, ref_b)

    print("KERNEL_OK")
</pallas_src>

<mosaic_0001>
module attributes {stable_mosaic.version = 11 : i64} {
  func.func @kernel(%arg0: i32, %arg1: i32, %arg2: memref<16x128xf32, #tpu.memory_space<vmem>>, %arg3: memref<16x128xf32, #tpu.memory_space<vmem>>, %arg4: memref<1x128xf32, #tpu.memory_space<vmem>>, %arg5: memref<8x128xf32, #tpu.memory_space<vmem>>) attributes {dimension_semantics = [#tpu.dimension_semantics<parallel>, #tpu.dimension_semantics<arbitrary>], iteration_bounds = array<i64: 1, 1>, scalar_prefetch = 0 : i64, scratch_operands = 1 : i64, tpu.core_type = #tpu.core_type<tc>, window_params = [{transform_indices = @transform_0, window_bounds = array<i64: 16, 128>}, {transform_indices = @transform_1, window_bounds = array<i64: 16, 128>}, {transform_indices = @transform_2, window_bounds = array<i64: 1, 128>}]} {
    %c0_i32 = arith.constant 0 : i32
    %0 = arith.cmpi eq, %arg1, %c0_i32 : i32
    %1 = arith.extui %0 : i1 to i32
    %c0_i32_0 = arith.constant 0 : i32
    %2 = arith.cmpi ne, %1, %c0_i32_0 : i32
    scf.if %2 {
      %cst = arith.constant 0.000000e+00 : f32
      %17 = vector.broadcast %cst : f32 to vector<8x128xf32>
      %c0 = arith.constant 0 : index
      %c0_9 = arith.constant 0 : index
      %18 = vector.load %arg5[%c0, %c0_9] : memref<8x128xf32, #tpu.memory_space<vmem>>, vector<8x128xf32>
      tpu.vector_store %arg5[%c0, %c0_9], %17 {strides = array<i32>} : memref<8x128xf32, #tpu.memory_space<vmem>>, vector<8x128xf32>,
    } else {
    }
    %c1_i32 = arith.constant 1 : i32
    %3 = arith.muli %arg0, %c1_i32 : i32
    %4 = arith.addi %3, %arg1 : i32
    %c2048_i32 = arith.constant 2048 : i32
    %5 = arith.muli %4, %c2048_i32 : i32
    %c2048_i32_1 = arith.constant 2048 : i32
    %6 = arith.addi %5, %c2048_i32_1 : i32
    %c2048_i32_2 = arith.constant 2048 : i32
    %7 = arith.cmpi sle, %6, %c2048_i32_2 : i32
    %8 = arith.extui %7 : i1 to i32
    %c0_i32_3 = arith.constant 0 : i32
    %9 = arith.cmpi ne, %8, %c0_i32_3 : i32
    scf.if %9 {
      %c0 = arith.constant 0 : index
      %c0_9 = arith.constant 0 : index
      %17 = vector.load %arg3[%c0, %c0_9] : memref<16x128xf32, #tpu.memory_space<vmem>>, vector<16x128xf32>
      %c0_10 = arith.constant 0 : index
      %c0_11 = arith.constant 0 : index
      %18 = vector.load %arg2[%c0_10, %c0_11] : memref<16x128xf32, #tpu.memory_space<vmem>>, vector<16x128xf32>
      %19 = arith.subf %17, %18 : vector<16x128xf32>
      %c0_12 = arith.constant 0 : index
      %c0_13 = arith.constant 0 : index
      %20 = vector.load %arg5[%c0_12, %c0_13] : memref<8x128xf32, #tpu.memory_space<vmem>>, vector<8x128xf32>
      %21 = vector.shape_cast %19 : vector<16x128xf32> to vector<1x2x8x128xf32>
      %22 = vector.extract_strided_slice %21 {offsets = [0, 0, 0, 0], sizes = [1, 1, 8, 128], strides = [1, 1, 1, 1]} : vector<1x2x8x128xf32> to vector<1x1x8x128xf32>
      %23 = vector.shape_cast %22 : vector<1x1x8x128xf32> to vector<1x8x128xf32>
      %cst = arith.constant 0.000000e+00 : f32
      %24 = vector.broadcast %cst : f32 to vector<1x8x128xf32>
      %25 = arith.maximumf %23, %24 : vector<1x8x128xf32>
      %26 = math.absf %23 : vector<1x8x128xf32>
      %cst_14 = arith.constant 0.000000e+00 : f32
      %27 = vector.broadcast %cst_14 : f32 to vector<1x8x128xf32>
      %28 = arith.subf %27, %26 : vector<1x8x128xf32>
      %29 = math.exp %28 : vector<1x8x128xf32>
      %cst_15 = arith.constant 1.000000e+00 : f32
      %30 = vector.broadcast %cst_15 : f32 to vector<1x8x128xf32>
      %31 = arith.addf %30, %29 : vector<1x8x128xf32>
      %32 = vector.extract_strided_slice %21 {offsets = [0, 1, 0, 0], sizes = [1, 1, 8, 128], strides = [1, 1, 1, 1]} : vector<1x2x8x128xf32> to vector<1x1x8x128xf32>
      %33 = vector.shape_cast %32 : vector<1x1x8x128xf32> to vector<1x8x128xf32>
      %cst_16 = arith.constant 0.000000e+00 : f32
      %34 = vector.broadcast %cst_16 : f32 to vector<1x8x128xf32>
      %35 = arith.maximumf %33, %34 : vector<1x8x128xf32>
      %36 = arith.addf %25, %35 : vector<1x8x128xf32>
      %37 = math.absf %33 : vector<1x8x128xf32>
      %cst_17 = arith.constant 0.000000e+00 : f32
      %38 = vector.broadcast %cst_17 : f32 to vector<1x8x128xf32>
      %39 = arith.subf %38, %37 : vector<1x8x128xf32>
      %40 = math.exp %39 : vector<1x8x128xf32>
      %cst_18 = arith.constant 1.000000e+00 : f32
      %41 = vector.broadcast %cst_18 : f32 to vector<1x8x128xf32>
      %42 = arith.addf %41, %40 : vector<1x8x128xf32>
      %43 = arith.mulf %31, %42 : vector<1x8x128xf32>
      %44 = math.log %43 : vector<1x8x128xf32>
      %45 = arith.addf %36, %44 : vector<1x8x128xf32>
      %cst_19 = arith.constant dense<0.000000e+00> : vector<8x128xf32>
      %46 = vector.multi_reduction <add>, %45, %cst_19 [0] : vector<1x8x128xf32> to vector<8x128xf32>
      %47 = arith.addf %20, %46 : vector<8x128xf32>
      %c0_20 = arith.constant 0 : index
      %c0_21 = arith.constant 0 : index
      %48 = vector.load %arg5[%c0_20, %c0_21] : memref<8x128xf32, #tpu.memory_space<vmem>>, vector<8x128xf32>
      tpu.vector_store %arg5[%c0_20, %c0_21], %47 {strides = array<i32>} : memref<8x128xf32, #tpu.memory_space<vmem>>, vector<8x128xf32>,
    } else {
    }
    %c2048_i32_4 = arith.constant 2048 : i32
    %10 = arith.addi %5, %c2048_i32_4 : i32
    %c2048_i32_5 = arith.constant 2048 : i32
    %11 = arith.cmpi sgt, %10, %c2048_i32_5 : i32
    %12 = arith.extui %11 : i1 to i32
    %c0_i32_6 = arith.constant 0 : i32
    %13 = arith.cmpi ne, %12, %c0_i32_6 : i32
    scf.if %13 {
      %c0 = arith.constant 0 : index
      %c0_9 = arith.constant 0 : index
      %17 = vector.load %arg3[%c0, %c0_9] : memref<16x128xf32, #tpu.memory_space<vmem>>, vector<16x128xf32>
      %c0_10 = arith.constant 0 : index
      %c0_11 = arith.constant 0 : index
      %18 = vector.load %arg2[%c0_10, %c0_11] : memref<16x128xf32, #tpu.memory_space<vmem>>, vector<16x128xf32>
      %19 = arith.subf %17, %18 : vector<16x128xf32>
      %20 = tpu.iota {dimensions = array<i32: 0>} : vector<16x128xi32>
      %21 = tpu.iota {dimensions = array<i32: 1>} : vector<16x128xi32>
      %c128_i32 = arith.constant 128 : i32
      %22 = vector.broadcast %c128_i32 : i32 to vector<16x128xi32>
      %23 = arith.muli %20, %22 : vector<16x128xi32>
      %24 = vector.broadcast %5 : i32 to vector<16x128xi32>
      %25 = arith.addi %24, %23 : vector<16x128xi32>
      %26 = arith.addi %25, %21 : vector<16x128xi32>
      %c0_12 = arith.constant 0 : index
      %c0_13 = arith.constant 0 : index
      %27 = vector.load %arg5[%c0_12, %c0_13] : memref<8x128xf32, #tpu.memory_space<vmem>>, vector<8x128xf32>
      %c2048_i32_14 = arith.constant 2048 : i32
      %28 = vector.broadcast %c2048_i32_14 : i32 to vector<16x128xi32>
      %29 = arith.cmpi slt, %26, %28 : vector<16x128xi32>
      %cst = arith.constant -1.000000e+30 : f32
      %30 = vector.broadcast %cst : f32 to vector<16x128xf32>
      %31 = arith.select %29, %19, %30 : vector<16x128xi1>, vector<16x128xf32>
      %32 = vector.shape_cast %31 : vector<16x128xf32> to vector<1x2x8x128xf32>
      %33 = vector.extract_strided_slice %32 {offsets = [0, 0, 0, 0], sizes = [1, 1, 8, 128], strides = [1, 1, 1, 1]} : vector<1x2x8x128xf32> to vector<1x1x8x128xf32>
      %34 = vector.shape_cast %33 : vector<1x1x8x128xf32> to vector<1x8x128xf32>
      %cst_15 = arith.constant 0.000000e+00 : f32
      %35 = vector.broadcast %cst_15 : f32 to vector<1x8x128xf32>
      %36 = arith.maximumf %34, %35 : vector<1x8x128xf32>
      %37 = math.absf %34 : vector<1x8x128xf32>
      %cst_16 = arith.constant 0.000000e+00 : f32
      %38 = vector.broadcast %cst_16 : f32 to vector<1x8x128xf32>
      %39 = arith.subf %38, %37 : vector<1x8x128xf32>
      %40 = math.exp %39 : vector<1x8x128xf32>
      %cst_17 = arith.constant 1.000000e+00 : f32
      %41 = vector.broadcast %cst_17 : f32 to vector<1x8x128xf32>
      %42 = arith.addf %41, %40 : vector<1x8x128xf32>
      %43 = vector.extract_strided_slice %32 {offsets = [0, 1, 0, 0], sizes = [1, 1, 8, 128], strides = [1, 1, 1, 1]} : vector<1x2x8x128xf32> to vector<1x1x8x128xf32>
      %44 = vector.shape_cast %43 : vector<1x1x8x128xf32> to vector<1x8x128xf32>
      %cst_18 = arith.constant 0.000000e+00 : f32
      %45 = vector.broadcast %cst_18 : f32 to vector<1x8x128xf32>
      %46 = arith.maximumf %44, %45 : vector<1x8x128xf32>
      %47 = arith.addf %36, %46 : vector<1x8x128xf32>
      %48 = math.absf %44 : vector<1x8x128xf32>
      %cst_19 = arith.constant 0.000000e+00 : f32
      %49 = vector.broadcast %cst_19 : f32 to vector<1x8x128xf32>
      %50 = arith.subf %49, %48 : vector<1x8x128xf32>
      %51 = math.exp %50 : vector<1x8x128xf32>
      %cst_20 = arith.constant 1.000000e+00 : f32
      %52 = vector.broadcast %cst_20 : f32 to vector<1x8x128xf32>
      %53 = arith.addf %52, %51 : vector<1x8x128xf32>
      %54 = arith.mulf %42, %53 : vector<1x8x128xf32>
      %55 = math.log %54 : vector<1x8x128xf32>
      %56 = arith.addf %47, %55 : vector<1x8x128xf32>
      %cst_21 = arith.constant dense<0.000000e+00> : vector<8x128xf32>
      %57 = vector.multi_reduction <add>, %56, %cst_21 [0] : vector<1x8x128xf32> to vector<8x128xf32>
      %58 = arith.addf %27, %57 : vector<8x128xf32>
      %c0_22 = arith.constant 0 : index
      %c0_23 = arith.constant 0 : index
      %59 = vector.load %arg5[%c0_22, %c0_23] : memref<8x128xf32, #tpu.memory_space<vmem>>, vector<8x128xf32>
      tpu.vector_store %arg5[%c0_22, %c0_23], %58 {strides = array<i32>} : memref<8x128xf32, #tpu.memory_space<vmem>>, vector<8x128xf32>,
    } else {
    }
    %c0_i32_7 = arith.constant 0 : i32
    %14 = arith.cmpi eq, %arg1, %c0_i32_7 : i32
    %15 = arith.extui %14 : i1 to i32
    %c0_i32_8 = arith.constant 0 : i32
    %16 = arith.cmpi ne, %15, %c0_i32_8 : i32
    scf.if %16 {
      %c0 = arith.constant 0 : index
      %c0_9 = arith.constant 0 : index
      %17 = vector.load %arg5[%c0, %c0_9] : memref<8x128xf32, #tpu.memory_space<vmem>>, vector<8x128xf32>
      %cst = arith.constant dense<0.000000e+00> : vector<128xf32>
      %18 = vector.multi_reduction <add>, %17, %cst [0] : vector<8x128xf32> to vector<128xf32>
      %c0_10 = arith.constant 0 : index
      %c0_11 = arith.constant 0 : index
      %19 = vector.load %arg4[%c0_10, %c0_11] : memref<1x128xf32, #tpu.memory_space<vmem>>, vector<1x128xf32>
      %20 = vector.shape_cast %19 : vector<1x128xf32> to vector<128xf32>
      %21 = vector.shape_cast %18 : vector<128xf32> to vector<1x128xf32>
      tpu.vector_store %arg4[%c0_10, %c0_11], %21 {strides = array<i32>} : memref<1x128xf32, #tpu.memory_space<vmem>>, vector<1x128xf32>,
    } else {
    }
    return
  }
  func.func @transform_0(%arg0: i32, %arg1: i32) -> (i32, i32) {
    %c1_i32 = arith.constant 1 : i32
    %0 = arith.muli %arg0, %c1_i32 : i32
    %1 = arith.addi %0, %arg1 : i32
    %c0_i32 = arith.constant 0 : i32
    %2 = arith.minsi %1, %c0_i32 : i32
    %c0_i32_0 = arith.constant 0 : i32
    %c0_i32_1 = arith.constant 0 : i32
    return %2, %c0_i32_0 : i32, i32
  }
  func.func @transform_1(%arg0: i32, %arg1: i32) -> (i32, i32) {
    %c1_i32 = arith.constant 1 : i32
    %0 = arith.muli %arg0, %c1_i32 : i32
    %1 = arith.addi %0, %arg1 : i32
    %c0_i32 = arith.constant 0 : i32
    %2 = arith.minsi %1, %c0_i32 : i32
    %c0_i32_0 = arith.constant 0 : i32
    %c0_i32_1 = arith.constant 0 : i32
    return %2, %c0_i32_0 : i32, i32
  }
  func.func @transform_2(%arg0: i32, %arg1: i32) -> (i32, i32) {
    %c0_i32 = arith.constant 0 : i32
    %c0_i32_0 = arith.constant 0 : i32
    return %arg0, %c0_i32 : i32, i32
  }
}

</mosaic_0001>

<bundles_post_ra>
// kernel: bpr_loss.1
= control target key start
LH: loop header
LB: loop body
LE: loop exit
PB: predicated region body
PF: predicated region fallthrough
CT: control target
= control target key end

     0   :  { %7 = vsyncpa [#allocation4], 0  ;;  %s260_s0 = inlined_call_operand.hbm [shape: f32[16,128], index: 0, kind: input, shape index: {}]   ;;  %s261_s1 = inlined_call_operand.hbm [shape: f32[16,128], index: 1, kind: input, shape index: {}]   ;;  %s262_s2 = inlined_call_operand.vmem [shape: f32[1,128], index: 2, kind: output, shape index: {}]  }
   0x1   :  { %s19_s11 = sshll.u32 %s260_s0, 4  ;;  %s20_s11 = int_to_ptr.hbm [resolvable:$true] %s19_s11 }
   0x2   :  { %8 = vsyncpa [#allocation6], 0  ;;  %s232_s12 = smov [#allocation3]   ;;  %s38_s16 = sshll.u32 %s261_s1, 4  ;;  %s39_s16 = int_to_ptr.hbm [resolvable:$true] %s38_s16 }
   0x3   :  { %s21_s13 = sshll.u32 %s232_s12, 4  ;;  %s233_s17 = smov 128   ;;  %s22_s13 = int_to_ptr.vmem [resolvable:$true] %s21_s13 }
   0x4   :  { %s234_s18 = smov 8   ;;  %s235_s19 = smov [#allocation5]  }
   0x5   :  { %27 = dma.hbm_to_vmem [thread:$0]  %s20_s11, 256, %s22_s13, [#allocation4], %s233_s17, %s233_s17, %s234_s18  }
   0x6   :  { %s40_s20 = sshll.u32 %s235_s19, 4  ;;  %s41_s20 = int_to_ptr.vmem [resolvable:$true] %s40_s20 }
   0x7   :  { %46 = dma.hbm_to_vmem [thread:$0]  %s39_s16, 256, %s41_s20, [#allocation6], %s233_s17, %s233_s17, %s234_s18  }
   0x8   :  { %228 = dma.done.wait [#allocation4], 256  }
   0x9   :  { %229 = vsyncadd [#allocation4], 4294967040 }
   0xa   :  { %230 = dma.done.wait [#allocation6], 256  }
   0xb   :  { %231 = vsyncadd [#allocation6], 4294967040  ;;  %v75_v0 = vld [vmem:[#allocation5] sm:$0xff]  ;;  %v76_v1 = vld [vmem:[#allocation5 + $0x8] sm:$0xff] }
   0xc   :  { %v77_v2 = vld [vmem:[#allocation3] sm:$0xff]  ;;  %v78_v3 = vld [vmem:[#allocation3 + $0x8] sm:$0xff] }
   0xd   :  { %v79_v4 = vsub.f32 %v75_v0, %v77_v2  ;;  %v80_v5 = vsub.f32 %v76_v1, %v78_v3 }
   0xf   :  { %v83_v6 = vand.u32 2147483647, %v79_v4  ;;  %v90_v7 = vand.u32 2147483647, %v80_v5  ;;  %v82_v17 = vmax.f32 %v79_v4, 0.0  ;;  %v88_v18 = vmax.f32 %v80_v5, 0.0 }
  0x11   :  { %v84_v8 = vsub.f32 0.0, %v83_v6  ;;  %v91_v9 = vsub.f32 0.0, %v90_v7  ;;  %v89_v19 = vadd.f32 %v88_v18, %v82_v17 }
  0x13   :  { %v85_v10 = vmul.f32 1.442695, %v84_v8  ;;  %v92_v11 = vmul.f32 1.442695, %v91_v9 }
  0x15   :  { %174 = vpow2.f32 %v85_v10 }
  0x16   :  { %176 = vpow2.f32 %v92_v11 }
  0x1b   :  { %v175_v12 = vpop.eup %174 }
  0x1c   :  { %v177_v13 = vpop.eup %176  ;;  %v87_v14 = vadd.f32 1.0, %v175_v12 }
  0x1d   :  { %v94_v15 = vadd.f32 1.0, %v177_v13 }
  0x1f   :  { %v95_v16 = vmul.f32 %v94_v15, %v87_v14 }
  0x21   :  { %178 = vlog2.f32 %v95_v16 }
  0x27   :  { %v179_v20 = vpop.eup %178 }
  0x28   :  { %v97_v21 = vmul.f32 0.6931472, %v179_v20 }
  0x2a   :  { %v98_v22 = vadd.f32 %v97_v21, %v89_v19 }
  0x2c   :  { %v153_v23 = vrot.slane %v98_v22, 4 }
  0x2e   :  { %v154_v24 = vadd.f32 %v153_v23, %v98_v22 }
  0x30   :  { %v155_v25 = vrot.slane %v154_v24, 2 }
  0x32   :  { %v156_v26 = vadd.f32 %v155_v25, %v154_v24 }
  0x34   :  { %v157_v27 = vrot.slane %v156_v26, 1 }
  0x36   :  { %v158_v28 = vadd.f32 %v157_v27, %v156_v26 }
  0x38   :  { %159 = vst [vmem:[%s262_s2] sm:$0x1] %v158_v28 }
  0x39   :  { %164 = vsyncpa [#allocation4], 1 }
  0x3a   :  { %165 = vsyncpa [#allocation6], 1 }

</bundles_post_ra>
